<compile_context>
chip_gen: v6e
topology: v6e:2x2x1
jax: 0.10.0
libtpu: 0.0.40
codegen_flags: <defaults>
</compile_context>

<pallas_src>
import functools

import jax
import jax.numpy as jnp
from jax import lax
from jax.experimental import pallas as pl
from jax.experimental.pallas import tpu as pltpu

LANES = 128
TM_MAX = 8192      # rows per block: 8192 * 128 * 4B = 4 MiB per f32 input block


def _reduce_rows(v, tm, acc_rows):
    """(tm, LANES) -> (acc_rows, LANES) partial sums (independent VPU chains)."""
    return v.reshape(tm // acc_rows, acc_rows, LANES).sum(axis=0)


def _charbonnier_kernel_1core(x_ref, y_ref, out_ref, *, eps2, tm, acc_rows,
                              rows, needs_mask):
    """1-D grid (single TensorCore): out_ref is the resident accumulator."""
    i = pl.program_id(0)
    nb = pl.num_programs(0)

    @pl.when(i == 0)
    def _init():
        out_ref[...] = jnp.zeros_like(out_ref)

    x = x_ref[...].astype(jnp.float32)
    y = y_ref[...].astype(jnp.float32)
    d = x - y
    val = jnp.sqrt(d * d + jnp.float32(eps2))          # (tm, LANES)

    if needs_mask:
        @pl.when(i < nb - 1)
        def _full():
            out_ref[...] += _reduce_rows(val, tm, acc_rows)

        @pl.when(i == nb - 1)
        def _last():
            # Row-constant predicate from a (tm, 1) iota; select is NaN-safe.
            rid = lax.broadcasted_iota(jnp.int32, (tm, 1), 0) + i * tm
            mval = jnp.where(rid < rows, val, jnp.float32(0.0))
            out_ref[...] += _reduce_rows(mval, tm, acc_rows)
    else:
        out_ref[...] += _reduce_rows(val, tm, acc_rows)


def _charbonnier_kernel_2core(x_ref, y_ref, out_ref, *, eps2, tm, acc_rows,
                              rows, nb, steps, needs_mask, has_empty):
    """(cores, steps) grid: leading axis is CORE_PARALLEL; per-core output slab."""
    c = pl.program_id(0)          # core axis
    i = pl.program_id(1)          # sequential block axis within this core
    b = c * steps + i             # global block index (>= nb -> empty block)

    @pl.when(i == 0)
    def _init():
        out_ref[...] = jnp.zeros_like(out_ref)

    x = x_ref[...].astype(jnp.float32)
    y = y_ref[...].astype(jnp.float32)
    d = x - y
    val = jnp.sqrt(d * d + jnp.float32(eps2))          # (tm, LANES)

    if needs_mask:
        @pl.when(b < nb - 1)
        def _full():
            out_ref[...] += _reduce_rows(val, tm, acc_rows)

        @pl.when(b == nb - 1)
        def _last():
            rid = lax.broadcasted_iota(jnp.int32, (tm, 1), 0) + b * tm
            mval = jnp.where(rid < rows, val, jnp.float32(0.0))
            out_ref[...] += _reduce_rows(mval, tm, acc_rows)
    elif has_empty:
        @pl.when(b < nb)          # skip clamped trailing blocks
        def _full():
            out_ref[...] += _reduce_rows(val, tm, acc_rows)
    else:
        out_ref[...] += _reduce_rows(val, tm, acc_rows)


def _num_tensorcores():
    """Best-effort TensorCores-per-chip (2 on v7x, else 1); safe fallback = 1."""
    try:
        kind = jax.devices()[0].device_kind.lower()
        if "v7" in kind or "7x" in kind:
            return 2
    except Exception:
        pass
    try:
        info = pltpu.get_tpu_info()
        for name in ("num_cores", "num_tensorcores", "tensorcores_per_chip",
                     "cores_per_chip", "num_cores_per_chip", "core_count"):
            v = getattr(info, name, None)
            if isinstance(v, int) and v >= 1:
                return min(int(v), 2)
    except Exception:
        pass
    return 1


def charbonnier_loss(x, y, eps=1e-3):
    """Charbonnier loss: mean(sqrt((x - y)^2 + eps^2)) over all elements."""
    assert x.shape == y.shape, (x.shape, y.shape)
    n = int(x.size)
    if n == 0:
        return jnp.float32(0.0)
    eps2 = float(eps) * float(eps)

    xf = jnp.ravel(x)                    # free reshape, native dtype kept
    yf = jnp.ravel(y)

    n_main = (n // LANES) * LANES        # prefix handled by the kernel
    tail = n - n_main                    # < 128 leftover elements (plain jnp)
    ragged = tail > 0

    total = jnp.float32(0.0)

    if n_main > 0:
        xm = xf if not ragged else xf[:n_main]
        ym = yf if not ragged else yf[:n_main]
        rows = n_main // LANES
        x2 = xm.reshape(rows, LANES)     # free reshape (no copy) when not ragged
        y2 = ym.reshape(rows, LANES)

        tm = TM_MAX if rows >= TM_MAX else rows   # small arrays: block == array
        nb = (rows + tm - 1) // tm
        needs_mask = (rows % tm) != 0

        if tm % 32 == 0:
            acc_rows = 32                # 4 independent (8,128) partial chains
        elif tm % 16 == 0:
            acc_rows = 16
        elif tm % 8 == 0:
            acc_rows = 8
        else:
            acc_rows = tm                # tiny arrays

        itemsize = jnp.dtype(x2.dtype).itemsize
        block_bytes = tm * LANES * itemsize
        # 2 inputs x 2 pipeline buffers + f32 intermediates + headroom.
        vmem_limit = int(min(64 * 1024 * 1024,
                             4 * block_bytes + 8 * tm * LANES * 4 + (2 << 20)))
        cost = pl.CostEstimate(flops=5 * n_main, transcendentals=n_main,
                               bytes_accessed=2 * n_main * itemsize)
        fusion = [True, True] if ragged else None

        ncores = _num_tensorcores()
        partial = None

        if ncores >= 2 and nb >= ncores:
            steps = (nb + ncores - 1) // ncores
            has_empty = ncores * steps != nb
            if has_empty:
                in_index = lambda c, i: (jnp.minimum(c * steps + i, nb - 1), 0)
            else:
                in_index = lambda c, i: (c * steps + i, 0)
            kernel = functools.partial(
                _charbonnier_kernel_2core, eps2=eps2, tm=tm, acc_rows=acc_rows,
                rows=rows, nb=nb, steps=steps, needs_mask=needs_mask,
                has_empty=has_empty)
            try:
                partial = pl.pallas_call(
                    kernel,
                    out_shape=jax.ShapeDtypeStruct((ncores, acc_rows, LANES),
                                                   jnp.float32),
                    grid_spec=pltpu.PrefetchScalarGridSpec(
                        num_scalar_prefetch=0,
                        grid=(ncores, steps),
                        in_specs=[pl.BlockSpec((tm, LANES), in_index),
                                  pl.BlockSpec((tm, LANES), in_index)],
                        out_specs=pl.BlockSpec((None, acc_rows, LANES),
                                               lambda c, i: (c, 0, 0)),
                    ),
                    compiler_params=pltpu.CompilerParams(
                        dimension_semantics=(pltpu.CORE_PARALLEL,
                                             pltpu.ARBITRARY),
                        vmem_limit_bytes=vmem_limit,
                        allow_input_fusion=fusion,
                    ),
                    cost_estimate=cost,
                )(x2, y2)
            except Exception:
                partial = None           # fall back to the single-core path

        if partial is None:
            kernel = functools.partial(
                _charbonnier_kernel_1core, eps2=eps2, tm=tm, acc_rows=acc_rows,
                rows=rows, needs_mask=needs_mask)
            partial = pl.pallas_call(
                kernel,
                out_shape=jax.ShapeDtypeStruct((acc_rows, LANES), jnp.float32),
                grid_spec=pltpu.PrefetchScalarGridSpec(
                    num_scalar_prefetch=0,
                    grid=(nb,),
                    in_specs=[pl.BlockSpec((tm, LANES), lambda i: (i, 0)),
                              pl.BlockSpec((tm, LANES), lambda i: (i, 0))],
                    out_specs=pl.BlockSpec((acc_rows, LANES),
                                           lambda i: (0, 0)),
                ),
                compiler_params=pltpu.CompilerParams(
                    dimension_semantics=("arbitrary",),
                    vmem_limit_bytes=vmem_limit,
                    allow_input_fusion=fusion,
                ),
                cost_estimate=cost,
            )(x2, y2)

        total = total + jnp.sum(partial)

    if tail > 0:
        # < 128 leftover elements: negligible, handled in plain jnp.
        tx = xf[n_main:].astype(jnp.float32)
        ty = yf[n_main:].astype(jnp.float32)
        td = tx - ty
        total = total + jnp.sum(jnp.sqrt(td * td + jnp.float32(eps2)))

    return total / jnp.float32(n)


def _reference(x, y, eps=1e-3):
    xf = x.astype(jnp.float32)
    yf = y.astype(jnp.float32)
    d = xf - yf
    return jnp.mean(jnp.sqrt(d * d + jnp.float32(eps * eps)))


if __name__ == "__main__":
    key = jax.random.PRNGKey(0)
    k = jax.random.split(key, 8)

    # 1) Primary small NCHW case (typical usage of the module).
    x = jax.random.normal(k[0], (2, 4, 16, 16), dtype=jnp.float32)
    y = jax.random.normal(k[1], (2, 4, 16, 16), dtype=jnp.float32)
    loss = jax.block_until_ready(charbonnier_loss(x, y, eps=1e-3))
    ref = _reference(x, y, eps=1e-3)
    assert jnp.allclose(loss, ref, rtol=1e-5, atol=1e-6), (loss, ref)

    # 2) Multi-block accumulation + masked last block (rows = 9216 > TM_MAX).
    x2 = jax.random.normal(k[2], (4, 8, 144, 256), dtype=jnp.float32)
    y2 = jax.random.normal(k[3], (4, 8, 144, 256), dtype=jnp.float32)
    loss2 = jax.block_until_ready(charbonnier_loss(x2, y2, eps=1e-3))
    ref2 = _reference(x2, y2, eps=1e-3)
    assert jnp.allclose(loss2, ref2, rtol=1e-4, atol=1e-6), (loss2, ref2)

    # 3) Ragged size (n % 128 != 0): kernel prefix + jnp tail.
    x3 = jax.random.normal(k[4], (3, 5, 7, 11), dtype=jnp.float32)
    y3 = jax.random.normal(k[5], (3, 5, 7, 11), dtype=jnp.float32)
    loss3 = jax.block_until_ready(charbonnier_loss(x3, y3, eps=1e-3))
    ref3 = _reference(x3, y3, eps=1e-3)
    assert jnp.allclose(loss3, ref3, rtol=1e-5, atol=1e-6), (loss3, ref3)

    # 4) Native bf16 streaming (cast to f32 inside the kernel).
    x4 = jax.random.normal(k[6], (2, 3, 32, 64), dtype=jnp.bfloat16)
    y4 = jax.random.normal(k[7], (2, 3, 32, 64), dtype=jnp.bfloat16)
    loss4 = jax.block_until_ready(charbonnier_loss(x4, y4, eps=1e-3))
    ref4 = _reference(x4, y4, eps=1e-3)
    assert jnp.allclose(loss4, ref4, rtol=1e-4, atol=1e-5), (loss4, ref4)

    print("KERNEL_OK")
</pallas_src>

<mosaic_0001>
module attributes {stable_mosaic.version = 11 : i64} {
  func.func @_charbonnier_kernel_1core(%arg0: i32, %arg1: memref<16x128xf32, #tpu.memory_space<vmem>>, %arg2: memref<16x128xf32, #tpu.memory_space<vmem>>, %arg3: memref<16x128xf32, #tpu.memory_space<vmem>>) attributes {dimension_semantics = [#tpu.dimension_semantics<arbitrary>], iteration_bounds = array<i64: 1>, scalar_prefetch = 0 : i64, scratch_operands = 0 : i64, tpu.core_type = #tpu.core_type<tc>, window_params = [{transform_indices = @transform_0, window_bounds = array<i64: 16, 128>}, {transform_indices = @transform_1, window_bounds = array<i64: 16, 128>}, {pipeline_mode = #tpu.pipeline_mode<synchronous>, transform_indices = @transform_2, window_bounds = array<i64: 16, 128>}]} {
    %c0_i32 = arith.constant 0 : i32
    %0 = arith.cmpi eq, %arg0, %c0_i32 : i32
    %1 = arith.extui %0 : i1 to i32
    %c0_i32_0 = arith.constant 0 : i32
    %2 = arith.cmpi ne, %1, %c0_i32_0 : i32
    scf.if %2 {
      %cst_9 = arith.constant 0.000000e+00 : f32
      %15 = vector.broadcast %cst_9 : f32 to vector<16x128xf32>
      %c0_10 = arith.constant 0 : index
      %c0_11 = arith.constant 0 : index
      %16 = vector.load %arg3[%c0_10, %c0_11] : memref<16x128xf32, #tpu.memory_space<vmem>>, vector<16x128xf32>
      tpu.vector_store %arg3[%c0_10, %c0_11], %15 {strides = array<i32>} : memref<16x128xf32, #tpu.memory_space<vmem>>, vector<16x128xf32>,
    } else {
    }
    %c0 = arith.constant 0 : index
    %c0_1 = arith.constant 0 : index
    %3 = vector.load %arg1[%c0, %c0_1] : memref<16x128xf32, #tpu.memory_space<vmem>>, vector<16x128xf32>
    %c0_2 = arith.constant 0 : index
    %c0_3 = arith.constant 0 : index
    %4 = vector.load %arg2[%c0_2, %c0_3] : memref<16x128xf32, #tpu.memory_space<vmem>>, vector<16x128xf32>
    %5 = arith.subf %3, %4 : vector<16x128xf32>
    %6 = arith.mulf %5, %5 : vector<16x128xf32>
    %cst = arith.constant 9.99999997E-7 : f32
    %7 = vector.broadcast %cst : f32 to vector<16x128xf32>
    %8 = arith.addf %6, %7 : vector<16x128xf32>
    %9 = math.sqrt %8 : vector<16x128xf32>
    %c0_4 = arith.constant 0 : index
    %c0_5 = arith.constant 0 : index
    %10 = vector.load %arg3[%c0_4, %c0_5] : memref<16x128xf32, #tpu.memory_space<vmem>>, vector<16x128xf32>
    %11 = vector.shape_cast %9 : vector<16x128xf32> to vector<1x16x128xf32>
    %cst_6 = arith.constant dense<0.000000e+00> : vector<16x128xf32>
    %12 = vector.multi_reduction <add>, %11, %cst_6 [0] : vector<1x16x128xf32> to vector<16x128xf32>
    %13 = arith.addf %10, %12 : vector<16x128xf32>
    %c0_7 = arith.constant 0 : index
    %c0_8 = arith.constant 0 : index
    %14 = vector.load %arg3[%c0_7, %c0_8] : memref<16x128xf32, #tpu.memory_space<vmem>>, vector<16x128xf32>
    tpu.vector_store %arg3[%c0_7, %c0_8], %13 {strides = array<i32>} : memref<16x128xf32, #tpu.memory_space<vmem>>, vector<16x128xf32>,
    return
  }
  func.func @transform_0(%arg0: i32) -> (i32, i32) {
    %c0_i32 = arith.constant 0 : i32
    %c0_i32_0 = arith.constant 0 : i32
    return %arg0, %c0_i32 : i32, i32
  }
  func.func @transform_1(%arg0: i32) -> (i32, i32) {
    %c0_i32 = arith.constant 0 : i32
    %c0_i32_0 = arith.constant 0 : i32
    return %arg0, %c0_i32 : i32, i32
  }
  func.func @transform_2(%arg0: i32) -> (i32, i32) {
    %c0_i32 = arith.constant 0 : i32
    %c0_i32_0 = arith.constant 0 : i32
    %c0_i32_1 = arith.constant 0 : i32
    return %c0_i32, %c0_i32_0 : i32, i32
  }
}

</mosaic_0001>

<bundles_post_ra>
// kernel: tpu_custom_call.1
= control target key start
LH: loop header
LB: loop body
LE: loop exit
PB: predicated region body
PF: predicated region fallthrough
CT: control target
= control target key end

     0   :  { %7 = vsyncpa [#allocation3], 0  ;;  %s210_s0 = inlined_call_operand.hbm [shape: f32[16,128], index: 0, kind: input, shape index: {}]   ;;  %s211_s1 = inlined_call_operand.hbm [shape: f32[16,128], index: 1, kind: input, shape index: {}]   ;;  %s212_s2 = inlined_call_operand.hbm [shape: f32[16,128], index: 2, kind: output, shape index: {}]  }
   0x1   :  { %8 = vsyncpa [#allocation6], 0 }
   0x2   :  { %9 = vsyncpa [#allocation4], 0  ;;  %s172_s9 = smov [#allocation2]  }
   0x3   :  { %s15_s10 = sshll.u32 %s172_s9, 4  ;;  %s16_s10 = int_to_ptr.vmem [resolvable:$true] %s15_s10 }
   0x4   :  { %s114_s11 = scalar_lea.vmem %s16_s10, 256  ;;  %p119_p1 = scmp.lt.s32.totalorder %s16_s10, %s16_s10 }
   0x5   :  { %p115_p0 = scmp.ne.s32.totalorder %s16_s10, %s114_s11  ;;  %p120_p2 = scmp.lt.s32.totalorder %s114_s11, %s114_s11 }
   0x7   :  { %p121_p3 = por %p120_p2, %p119_p1 }
   0x9   :  { %p122_p4 = pnand %p121_p3, %p115_p0 }
   0xb   :  { %125 = shalt.err (!%p122_p4)
}
   0xc   :  { %s173_s12 = smov 128   ;;  %s174_s13 = smov 8  }
   0xd   :  { %21 = dma.hbm_to_vmem [thread:$0]  %s210_s0, 256, %s16_s10, [#allocation3], %s173_s12, %s173_s12, %s174_s13  }
   0xe   :  { %s175_s16 = smov [#allocation5]  }
   0xf   :  { %s27_s17 = sshll.u32 %s175_s16, 4  ;;  %s28_s17 = int_to_ptr.vmem [resolvable:$true] %s27_s17 }
  0x10   :  { %s134_s18 = scalar_lea.vmem %s28_s17, 256  ;;  %p139_p6 = scmp.lt.s32.totalorder %s28_s17, %s28_s17 }
  0x11   :  { %p135_p5 = scmp.ne.s32.totalorder %s28_s17, %s134_s18  ;;  %p140_p7 = scmp.lt.s32.totalorder %s134_s18, %s134_s18 }
  0x13   :  { %p141_p8 = por %p140_p7, %p139_p6 }
  0x15   :  { %p142_p9 = pnand %p141_p8, %p135_p5 }
  0x17   :  { %145 = shalt.err (!%p142_p9)
}
  0x18   :  { %33 = dma.hbm_to_vmem [thread:$0]  %s211_s1, 256, %s28_s17, [#allocation6], %s173_s12, %s173_s12, %s174_s13  }
  0x19   :  { %166 = dma.done.wait [#allocation3], 256  }
  0x1a   :  { %167 = vsyncadd [#allocation3], 4294967040 }
  0x1b   :  { %168 = dma.done.wait [#allocation6], 256  }
  0x1c   :  { %169 = vsyncadd [#allocation6], 4294967040  ;;  %v46_v0 = vld [vmem:[#allocation2] sm:$0xff]  ;;  %v48_v1 = vld [vmem:[#allocation5] sm:$0xff]  ;;  %s176_s0 = smov [#allocation7]  }
  0x1d   :  { %v47_v2 = vld [vmem:[#allocation2 + $0x8] sm:$0xff]  ;;  %v50_v3 = vsub.f32 %v46_v0, %v48_v1  ;;  %v49_v4 = vld [vmem:[#allocation5 + $0x8] sm:$0xff]  ;;  %s83_s1 = sshll.u32 %s176_s0, 4  ;;  %s84_s1 = int_to_ptr.vmem [resolvable:$true] %s83_s1 }
  0x1e   :  { %v51_v5 = vsub.f32 %v47_v2, %v49_v4  ;;  %s146_s21 = scalar_lea.vmem %s84_s1, 256  ;;  %p151_p11 = scmp.lt.s32.totalorder %s84_s1, %s84_s1 }
  0x1f   :  { %v52_v6 = vmul.f32 %v50_v3, %v50_v3  ;;  %p147_p10 = scmp.ne.s32.totalorder %s84_s1, %s146_s21  ;;  %p152_p12 = scmp.lt.s32.totalorder %s146_s21, %s146_s21 }
  0x20   :  { %v53_v7 = vmul.f32 %v51_v5, %v51_v5 }
  0x21   :  { %v54_v8 = vadd.f32 1e-06, %v52_v6  ;;  %p153_p13 = por %p152_p12, %p151_p11 }
  0x22   :  { %v55_v9 = vadd.f32 1e-06, %v53_v7 }
  0x23   :  { %102 = vrsqrt.f32 %v54_v8  ;;  %vm58_vm0 = vcmp.eq.f32.partialorder %v54_v8, inf  ;;  %v61_v11 = vand.u32 2147483648, %v54_v8  ;;  %vm60_vm1 = vcmp.eq.f32.partialorder %v54_v8, 0.0  ;;  %p154_p0 = pnand %p153_p13, %p147_p10 }
  0x24   :  { %104 = vrsqrt.f32 %v55_v9  ;;  %vm65_vm2 = vcmp.eq.f32.partialorder %v55_v9, inf  ;;  %v68_v14 = vand.u32 2147483648, %v55_v9  ;;  %vm67_vm3 = vcmp.eq.f32.partialorder %v55_v9, 0.0 }
  0x30   :  { %v103_v10 = vpop.eup %102 }
  0x31   :  { %v105_v12 = vpop.eup %104  ;;  %v57_v13 = vmul.f32 %v103_v10, %v54_v8 }
  0x32   :  { %v64_v15 = vmul.f32 %v105_v12, %v55_v9 }
  0x33   :  { %v59_v16 = vsel %vm58_vm0, %v54_v8, %v57_v13 }
  0x34   :  { %v62_v17 = vsel %vm60_vm1, %v61_v11, %v59_v16  ;;  %v66_v18 = vsel %vm65_vm2, %v55_v9, %v64_v15 }
  0x35   :  { %v69_v19 = vsel %vm67_vm3, %v68_v14, %v66_v18  ;;  %76 = vst [vmem:[#allocation7] sm:$0xff] %v62_v17 }
  0x36   :  { %77 = vst [vmem:[#allocation7 + $0x8] sm:$0xff] %v69_v19 }
  0x37   :  { %157 = shalt.err (!%p154_p0)
}
  0x38   :  { %89 = dma.vmem_to_hbm [thread:$0]  %s84_s1, 256, %s212_s2, [#allocation4], %s173_s12, %s173_s12, %s174_s13  }
  0x39   :  { %170 = dma.done.wait [#allocation4], 256  }
  0x3a   :  { %171 = vsyncadd [#allocation4], 4294967040 }
  0x3b   :  { %93 = vsyncpa [#allocation3], 1 }
  0x3c   :  { %94 = vsyncpa [#allocation6], 1 }
  0x3d   :  { %95 = vsyncpa [#allocation4], 1 }

</bundles_post_ra>
